<compile_context>
chip_gen: v6e
topology: v6e:2x2x1
jax: 0.10.0
libtpu: 0.0.40
codegen_flags: <defaults>
</compile_context>

<pallas_src>
import functools

import jax
import jax.numpy as jnp
from jax.experimental import pallas as pl
from jax.experimental.pallas import tpu as pltpu


def _rmsnorm_kernel(x_ref, w_ref, o_ref, *, eps):
    # x_ref: (tm, dim)   w_ref: (1, dim)   o_ref: (tm, dim)
    x = x_ref[...].astype(jnp.float32)
    ms = jnp.mean(x * x, axis=-1, keepdims=True)            # (tm, 1), XLU reduce
    inv = jax.lax.rsqrt(ms + eps)                            # EUP rsqrt
    y = (x * inv) * w_ref[...].astype(jnp.float32)           # VPU
    o_ref[...] = y.astype(o_ref.dtype)


def _pick_tile_rows(M, dim, max_bytes=2 * 1024 * 1024, max_rows=2048):
    """Largest sublane-aligned row tile whose f32 block fits the VMEM budget."""
    rows = max(8, min(max_rows, max_bytes // (dim * 4)))
    rows = (rows // 8) * 8                                   # sublane-aligned
    if M <= rows:
        # Single grid step; round ragged M up to a multiple of 8 (pad rows).
        return max(8, ((M + 7) // 8) * 8)
    return rows


def rms_norm(x, weight, *, eps=1e-6, tm=None):
    """x: [..., dim]; weight: [dim].  Matches torch RMSNorm.forward semantics."""
    orig_shape = x.shape
    dim = orig_shape[-1]
    M = 1
    for s in orig_shape[:-1]:
        M *= s

    x2d = x.reshape(M, dim)
    w2d = weight.reshape(1, dim)

    if tm is None:
        tm = _pick_tile_rows(M, dim)
    tm = max(8, (min(tm, max(M, 8)) // 8) * 8)

    n_steps = pl.cdiv(M, tm)
    M_pad = n_steps * tm
    if M_pad != M:
        # Padded (zero) rows normalize to 0 via rsqrt(eps); sliced off below.
        x2d = jnp.pad(x2d, ((0, M_pad - M), (0, 0)))

    out2d = pl.pallas_call(
        functools.partial(_rmsnorm_kernel, eps=eps),
        out_shape=jax.ShapeDtypeStruct((M_pad, dim), x.dtype),
        grid_spec=pltpu.PrefetchScalarGridSpec(
            num_scalar_prefetch=0,
            grid=(n_steps,),
            in_specs=[
                pl.BlockSpec((tm, dim), lambda i: (i, 0)),   # streamed tokens
                pl.BlockSpec((1, dim), lambda i: (0, 0)),    # resident gain
            ],
            out_specs=pl.BlockSpec((tm, dim), lambda i: (i, 0)),
        ),
        compiler_params=pltpu.CompilerParams(
            dimension_semantics=("parallel",),
            vmem_limit_bytes=64 << 20,
        ),
    )(x2d, w2d)

    if M_pad != M:
        out2d = out2d[:M]
    return out2d.reshape(orig_shape)


def rms_norm_ref(x, weight, *, eps=1e-6):
    xf = x.astype(jnp.float32)
    inv = jax.lax.rsqrt(jnp.mean(xf * xf, axis=-1, keepdims=True) + eps)
    return (weight.astype(jnp.float32) * (xf * inv)).astype(x.dtype)


if __name__ == "__main__":
    # Module config: RMSNorm(dim=128), applied over [batch, seq, dim].
    batch, seq, dim = 2, 256, 128
    eps = 1e-6

    key = jax.random.PRNGKey(0)
    kx, kw = jax.random.split(key)
    x = jax.random.normal(kx, (batch, seq, dim), dtype=jnp.float32)
    weight = 1.0 + 0.02 * jax.random.normal(kw, (dim,), dtype=jnp.float32)

    out = jax.block_until_ready(rms_norm(x, weight, eps=eps))
    ref = rms_norm_ref(x, weight, eps=eps)
    assert out.shape == x.shape and out.dtype == x.dtype
    assert jnp.allclose(out, ref, atol=1e-5, rtol=1e-5), "f32 mismatch vs reference"

    # bf16 path exercises the `.float()` compute / `.to(x.dtype)` output cast.
    x_bf16 = x.astype(jnp.bfloat16)
    out_bf16 = jax.block_until_ready(rms_norm(x_bf16, weight, eps=eps))
    ref_bf16 = rms_norm_ref(x_bf16, weight, eps=eps)
    assert out_bf16.dtype == jnp.bfloat16
    assert jnp.allclose(out_bf16.astype(jnp.float32),
                        ref_bf16.astype(jnp.float32),
                        atol=5e-2, rtol=5e-2), "bf16 mismatch vs reference"

    # Ragged token count exercises the zero-pad + slice path.
    x_rag = jax.random.normal(kx, (3, 37, dim), dtype=jnp.float32)
    out_rag = jax.block_until_ready(rms_norm(x_rag, weight, eps=eps))
    ref_rag = rms_norm_ref(x_rag, weight, eps=eps)
    assert jnp.allclose(out_rag, ref_rag, atol=1e-5, rtol=1e-5), "ragged mismatch"

    print("KERNEL_OK")
</pallas_src>

<mosaic_0001>
module attributes {stable_mosaic.version = 11 : i64} {
  func.func @_rmsnorm_kernel(%arg0: i32, %arg1: memref<512x128xf32, #tpu.memory_space<vmem>>, %arg2: memref<1x128xf32, #tpu.memory_space<vmem>>, %arg3: memref<512x128xf32, #tpu.memory_space<vmem>>) attributes {dimension_semantics = [#tpu.dimension_semantics<parallel>], iteration_bounds = array<i64: 1>, scalar_prefetch = 0 : i64, scratch_operands = 0 : i64, tpu.core_type = #tpu.core_type<tc>, window_params = [{transform_indices = @transform_0, window_bounds = array<i64: 512, 128>}, {pipeline_mode = #tpu.pipeline_mode<synchronous>, transform_indices = @transform_1, window_bounds = array<i64: 1, 128>}, {transform_indices = @transform_2, window_bounds = array<i64: 512, 128>}]} {
    %c0 = arith.constant 0 : index
    %c0_0 = arith.constant 0 : index
    %0 = vector.load %arg1[%c0, %c0_0] : memref<512x128xf32, #tpu.memory_space<vmem>>, vector<512x128xf32>
    %1 = arith.mulf %0, %0 : vector<512x128xf32>
    %cst = arith.constant dense<0.000000e+00> : vector<512xf32>
    %2 = vector.multi_reduction <add>, %1, %cst [1] : vector<512x128xf32> to vector<512xf32>
    %3 = vector.shape_cast %2 : vector<512xf32> to vector<512x1xf32>
    %cst_1 = arith.constant 1.280000e+02 : f32
    %4 = vector.broadcast %cst_1 : f32 to vector<512x1xf32>
    %5 = arith.divf %3, %4 : vector<512x1xf32>
    %cst_2 = arith.constant 9.99999997E-7 : f32
    %6 = vector.broadcast %cst_2 : f32 to vector<512x1xf32>
    %7 = arith.addf %5, %6 : vector<512x1xf32>
    %8 = math.rsqrt %7 : vector<512x1xf32>
    %9 = vector.broadcast %8 : vector<512x1xf32> to vector<512x128xf32>
    %10 = arith.mulf %0, %9 : vector<512x128xf32>
    %c0_3 = arith.constant 0 : index
    %c0_4 = arith.constant 0 : index
    %11 = vector.load %arg2[%c0_3, %c0_4] : memref<1x128xf32, #tpu.memory_space<vmem>>, vector<1x128xf32>
    %12 = vector.broadcast %11 : vector<1x128xf32> to vector<512x128xf32>
    %13 = arith.mulf %10, %12 : vector<512x128xf32>
    %c0_5 = arith.constant 0 : index
    %c0_6 = arith.constant 0 : index
    %14 = vector.load %arg3[%c0_5, %c0_6] : memref<512x128xf32, #tpu.memory_space<vmem>>, vector<512x128xf32>
    tpu.vector_store %arg3[%c0_5, %c0_6], %13 {strides = array<i32>} : memref<512x128xf32, #tpu.memory_space<vmem>>, vector<512x128xf32>,
    return
  }
  func.func @transform_0(%arg0: i32) -> (i32, i32) {
    %c0_i32 = arith.constant 0 : i32
    %c0_i32_0 = arith.constant 0 : i32
    return %arg0, %c0_i32 : i32, i32
  }
  func.func @transform_1(%arg0: i32) -> (i32, i32) {
    %c0_i32 = arith.constant 0 : i32
    %c0_i32_0 = arith.constant 0 : i32
    %c0_i32_1 = arith.constant 0 : i32
    return %c0_i32, %c0_i32_0 : i32, i32
  }
  func.func @transform_2(%arg0: i32) -> (i32, i32) {
    %c0_i32 = arith.constant 0 : i32
    %c0_i32_0 = arith.constant 0 : i32
    return %arg0, %c0_i32 : i32, i32
  }
}

</mosaic_0001>

<bundles_post_ra>
// kernel: tpu_custom_call.1
= control target key start
LH: loop header
LB: loop body
LE: loop exit
PB: predicated region body
PF: predicated region fallthrough
CT: control target
= control target key end

     0   :  { %7 = vsyncpa [#allocation3], 0  ;;  %s1272_s0 = inlined_call_operand.hbm [shape: f32[512,128], index: 0, kind: input, shape index: {}]   ;;  %s1273_s1 = inlined_call_operand.vmem [shape: f32[1,128], index: 1, kind: input, shape index: {}]   ;;  %s1274_s2 = inlined_call_operand.hbm [shape: f32[512,128], index: 2, kind: output, shape index: {}]  }
   0x1   :  { %8 = vsyncpa [#allocation4], 0  ;;  %s872_s9 = smov [#allocation2]  }
   0x2   :  { %s14_s10 = sshll.u32 %s872_s9, 4  ;;  %s15_s10 = int_to_ptr.vmem [resolvable:$true] %s14_s10 }
   0x3   :  { %s836_s11 = scalar_lea.vmem %s15_s10, 8192  ;;  %p841_p1 = scmp.lt.s32.totalorder %s15_s10, %s15_s10 }
   0x4   :  { %p837_p0 = scmp.ne.s32.totalorder %s15_s10, %s836_s11  ;;  %p842_p2 = scmp.lt.s32.totalorder %s836_s11, %s836_s11 }
   0x6   :  { %p843_p3 = por %p842_p2, %p841_p1 }
   0x8   :  { %p844_p4 = pnand %p843_p3, %p837_p0 }
   0xa   :  { %847 = shalt.err (!%p844_p4)
}
   0xb   :  { %s873_s12 = smov 128   ;;  %s874_s13 = smov 8  }
   0xc   :  { %20 = dma.hbm_to_vmem [thread:$0]  %s1272_s0, 8192, %s15_s10, [#allocation3], %s873_s12, %s873_s12, %s874_s13  }
   0xd   :  { %868 = dma.done.wait [#allocation3], 8192  }
   0xe   :  { %869 = vsyncadd [#allocation3], 4294959104  ;;  %v897_v0 = vld [vmem:[#allocation2 + $0x10] sm:$0xff]  ;;  %v899_v1 = vld [vmem:[#allocation2] sm:$0xff] }
   0xf   :  { %v901_v2 = vld [vmem:[#allocation2 + $0x18] sm:$0xff]  ;;  %v92_v3 = vmul.f32 %v897_v0, %v897_v0  ;;  %v90_v4 = vmul.f32 %v899_v1, %v899_v1  ;;  %v907_v5 = vld [vmem:[#allocation2 + $0x8] sm:$0xff]  ;;  %v915_v9 = vld [vmem:[#allocation2 + $0x20] sm:$0xff] }
  0x10   :  { %v93_v6 = vmul.f32 %v901_v2, %v901_v2  ;;  %v91_v7 = vmul.f32 %v907_v5, %v907_v5  ;;  %v913_v8 = vld [vmem:[#allocation2 + $0x28] sm:$0xff]  ;;  %v94_v11 = vmul.f32 %v915_v9, %v915_v9  ;;  %v921_v12 = vld [vmem:[#allocation2 + $0x38] sm:$0xff]  ;;  %v923_v13 = vld [vmem:[#allocation2 + $0x30] sm:$0xff] }
  0x11   :  { %158 = vadd.xlane.f32.xlu1 %v92_v3  ;;  %154 = vadd.xlane.f32.xlu0 %v90_v4  ;;  %v95_v10 = vmul.f32 %v913_v8, %v913_v8  ;;  %v97_v14 = vmul.f32 %v921_v12, %v921_v12  ;;  %v96_v15 = vmul.f32 %v923_v13, %v923_v13  ;;  %v929_v16 = vld [vmem:[#allocation2 + $0x48] sm:$0xff]  ;;  %v931_v17 = vld [vmem:[#allocation2 + $0x40] sm:$0xff]  ;;  %v937_v20 = vld [vmem:[#allocation2 + $0x58] sm:$0xff] }
  0x12   :  { %v99_v18 = vmul.f32 %v929_v16, %v929_v16  ;;  %v98_v19 = vmul.f32 %v931_v17, %v931_v17  ;;  %v939_v21 = vld [vmem:[#allocation2 + $0x50] sm:$0xff]  ;;  %v101_v22 = vmul.f32 %v937_v20, %v937_v20  ;;  %v945_v24 = vld [vmem:[#allocation2 + $0x68] sm:$0xff]  ;;  %v947_v25 = vld [vmem:[#allocation2 + $0x60] sm:$0xff] }
  0x13   :  { %v100_v23 = vmul.f32 %v939_v21, %v939_v21  ;;  %v103_v26 = vmul.f32 %v945_v24, %v945_v24  ;;  %v102_v27 = vmul.f32 %v947_v25, %v947_v25  ;;  %v953_v28 = vld [vmem:[#allocation2 + $0x78] sm:$0xff]  ;;  %v955_v29 = vld [vmem:[#allocation2 + $0x70] sm:$0xff]  ;;  %v961_v32 = vld [vmem:[#allocation2 + $0x88] sm:$0xff] }
  0x14   :  { %v105_v30 = vmul.f32 %v953_v28, %v953_v28  ;;  %v104_v31 = vmul.f32 %v955_v29, %v955_v29  ;;  %v963_v33 = vld [vmem:[#allocation2 + $0x80] sm:$0xff]  ;;  %v107_v34 = vmul.f32 %v961_v32, %v961_v32  ;;  %v969_v36 = vld [vmem:[#allocation2 + $0x98] sm:$0xff]  ;;  %v971_v37 = vld [vmem:[#allocation2 + $0x90] sm:$0xff] }
  0x15   :  { %160 = vadd.xlane.f32.xlu1 %v93_v6  ;;  %156 = vadd.xlane.f32.xlu0 %v91_v7  ;;  %v106_v35 = vmul.f32 %v963_v33, %v963_v33  ;;  %v109_v38 = vmul.f32 %v969_v36, %v969_v36  ;;  %v108_v39 = vmul.f32 %v971_v37, %v971_v37  ;;  %v977_v40 = vld [vmem:[#allocation2 + $0xa8] sm:$0xff]  ;;  %v979_v41 = vld [vmem:[#allocation2 + $0xa0] sm:$0xff]  ;;  %v985_v44 = vld [vmem:[#allocation2 + $0xb8] sm:$0xff] }
  0x16   :  { %v111_v42 = vmul.f32 %v977_v40, %v977_v40  ;;  %v110_v43 = vmul.f32 %v979_v41, %v979_v41  ;;  %v987_v45 = vld [vmem:[#allocation2 + $0xb0] sm:$0xff]  ;;  %v113_v46 = vmul.f32 %v985_v44, %v985_v44  ;;  %v993_v48 = vld [vmem:[#allocation2 + $0xc8] sm:$0xff]  ;;  %v995_v49 = vld [vmem:[#allocation2 + $0xc0] sm:$0xff] }
  0x17   :  { %v112_v47 = vmul.f32 %v987_v45, %v987_v45  ;;  %v115_v50 = vmul.f32 %v993_v48, %v993_v48  ;;  %v114_v51 = vmul.f32 %v995_v49, %v995_v49  ;;  %v1001_v52 = vld [vmem:[#allocation2 + $0xd8] sm:$0xff]  ;;  %v1003_v53 = vld [vmem:[#allocation2 + $0xd0] sm:$0xff]  ;;  %v1009_v56 = vld [vmem:[#allocation2 + $0xe8] sm:$0xff] }
  0x18   :  { %v117_v54 = vmul.f32 %v1001_v52, %v1001_v52  ;;  %v116_v55 = vmul.f32 %v1003_v53, %v1003_v53  ;;  %v1011_v57 = vld [vmem:[#allocation2 + $0xe0] sm:$0xff]  ;;  %v119_v58 = vmul.f32 %v1009_v56, %v1009_v56  ;;  %v1017_v60 = vld [vmem:[#allocation2 + $0xf8] sm:$0xff]  ;;  %v1019_v61 = vld [vmem:[#allocation2 + $0xf0] sm:$0xff] }
  0x19   :  { %164 = vadd.xlane.f32.xlu1 %v95_v10  ;;  %162 = vadd.xlane.f32.xlu0 %v94_v11  ;;  %v118_v59 = vmul.f32 %v1011_v57, %v1011_v57  ;;  %v121_v62 = vmul.f32 %v1017_v60, %v1017_v60  ;;  %v120_v63 = vmul.f32 %v1019_v61, %v1019_v61  ;;  %v1025_v3 = vld [vmem:[#allocation2 + $0x108] sm:$0xff]  ;;  %v1027_v4 = vld [vmem:[#allocation2 + $0x100] sm:$0xff]  ;;  %v1033_v10 = vld [vmem:[#allocation2 + $0x118] sm:$0xff] }
  0x1a   :  { %v123_v6 = vmul.f32 %v1025_v3, %v1025_v3  ;;  %v122_v7 = vmul.f32 %v1027_v4, %v1027_v4  ;;  %v1035_v11 = vld [vmem:[#allocation2 + $0x110] sm:$0xff] }
  0x1d   :  { %168 = vadd.xlane.f32.xlu1 %v97_v14  ;;  %166 = vadd.xlane.f32.xlu0 %v96_v15  ;;  %v125_v14 = vmul.f32 %v1033_v10, %v1033_v10  ;;  %v124_v15 = vmul.f32 %v1035_v11, %v1035_v11 }
  0x21   :  { %172 = vadd.xlane.f32.xlu1 %v99_v18  ;;  %170 = vadd.xlane.f32.xlu0 %v98_v19  ;;  %v1041_v18 = vld [vmem:[#allocation2 + $0x128] sm:$0xff]  ;;  %v1043_v19 = vld [vmem:[#allocation2 + $0x120] sm:$0xff] }
  0x25   :  { %176 = vadd.xlane.f32.xlu1 %v101_v22  ;;  %174 = vadd.xlane.f32.xlu0 %v100_v23  ;;  %v127_v22 = vmul.f32 %v1041_v18, %v1041_v18  ;;  %v126_v23 = vmul.f32 %v1043_v19, %v1043_v19 }
  0x29   :  { %180 = vadd.xlane.f32.xlu1 %v103_v26  ;;  %178 = vadd.xlane.f32.xlu0 %v102_v27  ;;  %v1049_v26 = vld [vmem:[#allocation2 + $0x138] sm:$0xff]  ;;  %v1051_v27 = vld [vmem:[#allocation2 + $0x130] sm:$0xff] }
  0x2d   :  { %184 = vadd.xlane.f32.xlu1 %v105_v30  ;;  %182 = vadd.xlane.f32.xlu0 %v104_v31  ;;  %v129_v30 = vmul.f32 %v1049_v26, %v1049_v26  ;;  %v128_v31 = vmul.f32 %v1051_v27, %v1051_v27 }
  0x31   :  { %188 = vadd.xlane.f32.xlu1 %v107_v34  ;;  %186 = vadd.xlane.f32.xlu0 %v106_v35  ;;  %v1057_v34 = vld [vmem:[#allocation2 + $0x148] sm:$0xff]  ;;  %v1059_v35 = vld [vmem:[#allocation2 + $0x140] sm:$0xff] }
  0x35   :  { %192 = vadd.xlane.f32.xlu1 %v109_v38  ;;  %190 = vadd.xlane.f32.xlu0 %v108_v39  ;;  %v131_v38 = vmul.f32 %v1057_v34, %v1057_v34  ;;  %v130_v39 = vmul.f32 %v1059_v35, %v1059_v35 }
  0x39   :  { %196 = vadd.xlane.f32.xlu1 %v111_v42  ;;  %194 = vadd.xlane.f32.xlu0 %v110_v43  ;;  %v1065_v42 = vld [vmem:[#allocation2 + $0x158] sm:$0xff]  ;;  %v1067_v43 = vld [vmem:[#allocation2 + $0x150] sm:$0xff] }
  0x3d   :  { %200 = vadd.xlane.f32.xlu1 %v113_v46  ;;  %198 = vadd.xlane.f32.xlu0 %v112_v47  ;;  %v133_v46 = vmul.f32 %v1065_v42, %v1065_v42  ;;  %v132_v47 = vmul.f32 %v1067_v43, %v1067_v43 }
  0x41   :  { %204 = vadd.xlane.f32.xlu1 %v115_v50  ;;  %202 = vadd.xlane.f32.xlu0 %v114_v51  ;;  %v1073_v50 = vld [vmem:[#allocation2 + $0x168] sm:$0xff]  ;;  %v1075_v51 = vld [vmem:[#allocation2 + $0x160] sm:$0xff] }
  0x42   :  { %1290 = vst [vmem:[#allocation8_spill] sm:$0xff] %v1075_v51 }
  0x45   :  { %208 = vadd.xlane.f32.xlu1 %v117_v54  ;;  %206 = vadd.xlane.f32.xlu0 %v116_v55  ;;  %v135_v54 = vmul.f32 %v1073_v50, %v1073_v50  ;;  %v134_v55 = vmul.f32 %v1075_v51, %v1075_v51 }
  0x49   :  { %212 = vadd.xlane.f32.xlu1 %v119_v58  ;;  %210 = vadd.xlane.f32.xlu0 %v118_v59  ;;  %v1081_v58 = vld [vmem:[#allocation2 + $0x178] sm:$0xff]  ;;  %v1083_v59 = vld [vmem:[#allocation2 + $0x170] sm:$0xff] }
  0x4a   :  { %1291 = vst [vmem:[#allocation9_spill] sm:$0xff] %v1081_v58  ;;  %1292 = vst [vmem:[#allocation10_spill] sm:$0xff] %v1083_v59 }
  0x4d   :  { %216 = vadd.xlane.f32.xlu1 %v121_v62  ;;  %214 = vadd.xlane.f32.xlu0 %v120_v63  ;;  %v137_v62 = vmul.f32 %v1081_v58, %v1081_v58  ;;  %v136_v63 = vmul.f32 %v1083_v59, %v1083_v59 }
  0x51   :  { %220 = vadd.xlane.f32.xlu1 %v123_v6  ;;  %218 = vadd.xlane.f32.xlu0 %v122_v7  ;;  %v1089_v6 = vld [vmem:[#allocation2 + $0x188] sm:$0xff]  ;;  %v1091_v7 = vld [vmem:[#allocation2 + $0x180] sm:$0xff] }
  0x52   :  { %1293 = vst [vmem:[#allocation11_spill] sm:$0xff] %v1089_v6  ;;  %1294 = vst [vmem:[#allocation12_spill] sm:$0xff] %v1091_v7 }
  0x55   :  { %224 = vadd.xlane.f32.xlu1 %v125_v14  ;;  %222 = vadd.xlane.f32.xlu0 %v124_v15  ;;  %v139_v14 = vmul.f32 %v1089_v6, %v1089_v6  ;;  %v138_v15 = vmul.f32 %v1091_v7, %v1091_v7 }
  0x59   :  { %228 = vadd.xlane.f32.xlu1 %v127_v22  ;;  %226 = vadd.xlane.f32.xlu0 %v126_v23  ;;  %v1097_v22 = vld [vmem:[#allocation2 + $0x198] sm:$0xff]  ;;  %v1099_v23 = vld [vmem:[#allocation2 + $0x190] sm:$0xff] }
  0x5a   :  { %1295 = vst [vmem:[#allocation13_spill] sm:$0xff] %v1097_v22  ;;  %1296 = vst [vmem:[#allocation14_spill] sm:$0xff] %v1099_v23 }
  0x5d   :  { %232 = vadd.xlane.f32.xlu1 %v129_v30  ;;  %230 = vadd.xlane.f32.xlu0 %v128_v31  ;;  %v141_v30 = vmul.f32 %v1097_v22, %v1097_v22  ;;  %v140_v31 = vmul.f32 %v1099_v23, %v1099_v23 }
  0x61   :  { %236 = vadd.xlane.f32.xlu1 %v131_v38  ;;  %234 = vadd.xlane.f32.xlu0 %v130_v39  ;;  %v1105_v38 = vld [vmem:[#allocation2 + $0x1a8] sm:$0xff]  ;;  %v1107_v39 = vld [vmem:[#allocation2 + $0x1a0] sm:$0xff] }
  0x62   :  { %1297 = vst [vmem:[#allocation15_spill] sm:$0xff] %v1105_v38  ;;  %1298 = vst [vmem:[#allocation16_spill] sm:$0xff] %v1107_v39 }
  0x65   :  { %240 = vadd.xlane.f32.xlu1 %v133_v46  ;;  %238 = vadd.xlane.f32.xlu0 %v132_v47  ;;  %v143_v46 = vmul.f32 %v1105_v38, %v1105_v38  ;;  %v142_v47 = vmul.f32 %v1107_v39, %v1107_v39  ;;  %v89_v38 = vld [vmem:[#allocation2 + $0x1f8] sm:$0xff] }
  0x66   :  { %v153_v23 = vmul.f32 %v89_v38, %v89_v38 }
  0x69   :  { %244 = vadd.xlane.f32.xlu1 %v135_v54  ;;  %242 = vadd.xlane.f32.xlu0 %v134_v55  ;;  %v1113_v54 = vld [vmem:[#allocation2 + $0x1b8] sm:$0xff]  ;;  %v1115_v55 = vld [vmem:[#allocation2 + $0x1b0] sm:$0xff] }
  0x6a   :  { %1299 = vst [vmem:[#allocation17_spill] sm:$0xff] %v1113_v54  ;;  %1300 = vst [vmem:[#allocation18_spill] sm:$0xff] %v1115_v55 }
  0x6d   :  { %248 = vadd.xlane.f32.xlu1 %v137_v62  ;;  %246 = vadd.xlane.f32.xlu0 %v136_v63  ;;  %v145_v62 = vmul.f32 %v1113_v54, %v1113_v54  ;;  %v144_v63 = vmul.f32 %v1115_v55, %v1115_v55 }
  0x71   :  { %252 = vadd.xlane.f32.xlu1 %v139_v14  ;;  %250 = vadd.xlane.f32.xlu0 %v138_v15  ;;  %v1121_v14 = vld [vmem:[#allocation2 + $0x1c8] sm:$0xff]  ;;  %v1123_v15 = vld [vmem:[#allocation2 + $0x1c0] sm:$0xff] }
  0x72   :  { %1301 = vst [vmem:[#allocation19_spill] sm:$0xff] %v1121_v14  ;;  %1302 = vst [vmem:[#allocation20_spill] sm:$0xff] %v1123_v15 }
  0x75   :  { %256 = vadd.xlane.f32.xlu1 %v141_v30  ;;  %254 = vadd.xlane.f32.xlu0 %v140_v31  ;;  %v147_v30 = vmul.f32 %v1121_v14, %v1121_v14  ;;  %v146_v31 = vmul.f32 %v1123_v15, %v1123_v15  ;;  %v88_v15 = vld [vmem:[#allocation2 + $0x1f0] sm:$0xff] }
  0x76   :  { %v152_v22 = vmul.f32 %v88_v15, %v88_v15 }
  0x79   :  { %260 = vadd.xlane.f32.xlu1 %v143_v46  ;;  %258 = vadd.xlane.f32.xlu0 %v142_v47  ;;  %v1129_v46 = vld [vmem:[#allocation2 + $0x1d8] sm:$0xff]  ;;  %v1131_v47 = vld [vmem:[#allocation2 + $0x1d0] sm:$0xff] }
  0x7a   :  { %1303 = vst [vmem:[#allocation21_spill] sm:$0xff] %v1129_v46  ;;  %1304 = vst [vmem:[#allocation22_spill] sm:$0xff] %v1131_v47  ;;  %v149_v55 = vmul.f32 %v1129_v46, %v1129_v46  ;;  %v148_v54 = vmul.f32 %v1131_v47, %v1131_v47 }
  0x7d   :  { %264 = vadd.xlane.f32.xlu1 %v145_v62  ;;  %262 = vadd.xlane.f32.xlu0 %v144_v63  ;;  %v87_v62 = vld [vmem:[#allocation2 + $0x1e8] sm:$0xff]  ;;  %v86_v63 = vld [vmem:[#allocation2 + $0x1e0] sm:$0xff] }
  0x7e   :  { %v151_v14 = vmul.f32 %v87_v62, %v87_v62  ;;  %v150_v39 = vmul.f32 %v86_v63, %v86_v63 }
  0x81   :  { %268 = vadd.xlane.f32.xlu1 %v147_v30  ;;  %266 = vadd.xlane.f32.xlu0 %v146_v31 }
  0x85   :  { %272 = vadd.xlane.f32.xlu1 %v149_v55  ;;  %270 = vadd.xlane.f32.xlu0 %v148_v54 }
  0x89   :  { %276 = vadd.xlane.f32.xlu1 %v151_v14  ;;  %274 = vadd.xlane.f32.xlu0 %v150_v39 }
  0x8d   :  { %280 = vadd.xlane.f32.xlu1 %v153_v23  ;;  %278 = vadd.xlane.f32.xlu0 %v152_v22 }
  0x9a   :  { %v159_v30 = vpop.xlane.xlu1 %158  ;;  %v155_v31 = vpop.xlane.xlu0 %154 }
  0x9b   :  { %v285_v46 = vmul.f32 0.0078125, %v159_v30  ;;  %v283_v7 = vmul.f32 0.0078125, %v155_v31 }
  0x9d   :  { %v349_v6 = vadd.f32 1e-06, %v285_v46  ;;  %v347_v47 = vadd.f32 1e-06, %v283_v7 }
  0x9e   :  { %v161_v59 = vpop.xlane.xlu1 %160  ;;  %v157_v58 = vpop.xlane.xlu0 %156 }
  0x9f   :  { %696 = vrsqrt.f32 %v349_v6  ;;  %v286_v54 = vmul.f32 0.0078125, %v161_v59  ;;  %v284_v55 = vmul.f32 0.0078125, %v157_v58 }
  0xa0   :  { %698 = vrsqrt.f32 %v347_v47 }
  0xa1   :  { %v350_v62 = vadd.f32 1e-06, %v286_v54  ;;  %v348_v63 = vadd.f32 1e-06, %v284_v55 }
  0xa2   :  { %v165_v14 = vpop.xlane.xlu1 %164  ;;  %v163_v39 = vpop.xlane.xlu0 %162 }
  0xa3   :  { %700 = vrsqrt.f32 %v350_v62  ;;  %v288_v38 = vmul.f32 0.0078125, %v165_v14  ;;  %v287_v23 = vmul.f32 0.0078125, %v163_v39  ;;  %v1140_v62 = vld [vmem:[%s1273_s1] ss:$0 sm:$0xff]  ;;  %s875_s1 = smov [#allocation5]  }
  0xa4   :  { %702 = vrsqrt.f32 %v348_v63  ;;  %s679_s17 = sshll.u32 %s875_s1, 4  ;;  %s680_s17 = int_to_ptr.vmem [resolvable:$true] %s679_s17 }
  0xa5   :  { %v352_v22 = vadd.f32 1e-06, %v288_v38  ;;  %v351_v15 = vadd.f32 1e-06, %v287_v23  ;;  %s848_s18 = scalar_lea.vmem %s680_s17, 8192  ;;  %p853_p6 = scmp.lt.s32.totalorder %s680_s17, %s680_s17 }
  0xa6   :  { %v169_v30 = vpop.xlane.xlu1 %168  ;;  %v167_v31 = vpop.xlane.xlu0 %166  ;;  %p849_p5 = scmp.ne.s32.totalorder %s680_s17, %s848_s18  ;;  %p854_p7 = scmp.lt.s32.totalorder %s848_s18, %s848_s18 }
  0xa7   :  { %704 = vrsqrt.f32 %v352_v22  ;;  %v290_v7 = vmul.f32 0.0078125, %v169_v30  ;;  %v289_v46 = vmul.f32 0.0078125, %v167_v31 }
  0xa8   :  { %706 = vrsqrt.f32 %v351_v15  ;;  %p855_p8 = por %p854_p7, %p853_p6 }
  0xa9   :  { %v354_v6 = vadd.f32 1e-06, %v290_v7  ;;  %v353_v59 = vadd.f32 1e-06, %v289_v46 }
  0xaa   :  { %v173_v58 = vpop.xlane.xlu1 %172  ;;  %v171_v47 = vpop.xlane.xlu0 %170  ;;  %p856_p9 = pnand %p855_p8, %p849_p5 }
  0xab   :  { %708 = vrsqrt.f32 %v354_v6  ;;  %v292_v54 = vmul.f32 0.0078125, %v173_v58  ;;  %v291_v55 = vmul.f32 0.0078125, %v171_v47 }
  0xac   :  { %v697_v51 = vpop.eup %696  ;;  %710 = vrsqrt.f32 %v353_v59 }
  0xad   :  { %v699_v63 = vpop.eup %698  ;;  %v477_v14 = vmul.f32 %v697_v51, %v897_v0  ;;  %v356_v39 = vadd.f32 1e-06, %v292_v54  ;;  %v355_v38 = vadd.f32 1e-06, %v291_v55 }
  0xae   :  { %v475_v23 = vmul.f32 %v699_v63, %v899_v1  ;;  %v177_v22 = vpop.xlane.xlu1 %176  ;;  %v175_v15 = vpop.xlane.xlu0 %174 }
  0xaf   :  { %v548_v30 = vmul.f32 %v1140_v62, %v477_v14  ;;  %712 = vrsqrt.f32 %v356_v39  ;;  %v294_v31 = vmul.f32 0.0078125, %v177_v22  ;;  %v293_v7 = vmul.f32 0.0078125, %v175_v15 }
  0xb0   :  { %v701_v46 = vpop.eup %700  ;;  %v546_v6 = vmul.f32 %v1140_v62, %v475_v23  ;;  %714 = vrsqrt.f32 %v355_v38 }
  0xb1   :  { %v703_v58 = vpop.eup %702  ;;  %612 = vst [vmem:[#allocation5 + $0x10] sm:$0xff] %v548_v30  ;;  %v478_v59 = vmul.f32 %v701_v46, %v901_v2  ;;  %v358_v0 = vadd.f32 1e-06, %v294_v31  ;;  %v357_v51 = vadd.f32 1e-06, %v293_v7 }
  0xb2   :  { %610 = vst [vmem:[#allocation5] sm:$0xff] %v546_v6  ;;  %v476_v1 = vmul.f32 %v703_v58, %v907_v5  ;;  %v181_v47 = vpop.xlane.xlu1 %180  ;;  %v179_v54 = vpop.xlane.xlu0 %178 }
  0xb3   :  { %v549_v55 = vmul.f32 %v1140_v62, %v478_v59  ;;  %716 = vrsqrt.f32 %v358_v0  ;;  %v296_v63 = vmul.f32 0.0078125, %v181_v47  ;;  %v295_v14 = vmul.f32 0.0078125, %v179_v54 }
  0xb4   :  { %v705_v39 = vpop.eup %704  ;;  %v547_v23 = vmul.f32 %v1140_v62, %v476_v1  ;;  %718 = vrsqrt.f32 %v357_v51 }
  0xb5   :  { %v707_v38 = vpop.eup %706  ;;  %613 = vst [vmem:[#allocation5 + $0x18] sm:$0xff] %v549_v55  ;;  %v480_v2 = vmul.f32 %v705_v39, %v913_v8  ;;  %v360_v22 = vadd.f32 1e-06, %v296_v63  ;;  %v359_v15 = vadd.f32 1e-06, %v295_v14 }
  0xb6   :  { %611 = vst [vmem:[#allocation5 + $0x8] sm:$0xff] %v547_v23  ;;  %v479_v5 = vmul.f32 %v707_v38, %v915_v9  ;;  %v185_v30 = vpop.xlane.xlu1 %184  ;;  %v183_v31 = vpop.xlane.xlu0 %182 }
  0xb7   :  { %v551_v7 = vmul.f32 %v1140_v62, %v480_v2  ;;  %720 = vrsqrt.f32 %v360_v22  ;;  %v298_v46 = vmul.f32 0.0078125, %v185_v30  ;;  %v297_v6 = vmul.f32 0.0078125, %v183_v31 }
  0xb8   :  { %v709_v58 = vpop.eup %708  ;;  %v550_v59 = vmul.f32 %v1140_v62, %v479_v5  ;;  %722 = vrsqrt.f32 %v359_v15 }
  0xb9   :  { %v711_v0 = vpop.eup %710  ;;  %615 = vst [vmem:[#allocation5 + $0x28] sm:$0xff] %v551_v7  ;;  %v482_v8 = vmul.f32 %v709_v58, %v921_v12  ;;  %v362_v51 = vadd.f32 1e-06, %v298_v46  ;;  %v361_v1 = vadd.f32 1e-06, %v297_v6 }
  0xba   :  { %614 = vst [vmem:[#allocation5 + $0x20] sm:$0xff] %v550_v59  ;;  %v481_v9 = vmul.f32 %v711_v0, %v923_v13  ;;  %v189_v47 = vpop.xlane.xlu1 %188  ;;  %v187_v54 = vpop.xlane.xlu0 %186 }
  0xbb   :  { %v553_v55 = vmul.f32 %v1140_v62, %v482_v8  ;;  %724 = vrsqrt.f32 %v362_v51  ;;  %v300_v63 = vmul.f32 0.0078125, %v189_v47  ;;  %v299_v14 = vmul.f32 0.0078125, %v187_v54 }
  0xbc   :  { %v713_v39 = vpop.eup %712  ;;  %v552_v23 = vmul.f32 %v1140_v62, %v481_v9  ;;  %726 = vrsqrt.f32 %v361_v1 }
  0xbd   :  { %v715_v38 = vpop.eup %714  ;;  %617 = vst [vmem:[#allocation5 + $0x38] sm:$0xff] %v553_v55  ;;  %v484_v12 = vmul.f32 %v713_v39, %v929_v16  ;;  %v364_v2 = vadd.f32 1e-06, %v300_v63  ;;  %v363_v22 = vadd.f32 1e-06, %v299_v14 }
  0xbe   :  { %616 = vst [vmem:[#allocation5 + $0x30] sm:$0xff] %v552_v23  ;;  %v483_v13 = vmul.f32 %v715_v38, %v931_v17  ;;  %v193_v15 = vpop.xlane.xlu1 %192  ;;  %v191_v5 = vpop.xlane.xlu0 %190 }
  0xbf   :  { %v555_v30 = vmul.f32 %v1140_v62, %v484_v12  ;;  %728 = vrsqrt.f32 %v364_v2  ;;  %v302_v31 = vmul.f32 0.0078125, %v193_v15  ;;  %v301_v7 = vmul.f32 0.0078125, %v191_v5 }
  0xc0   :  { %v717_v46 = vpop.eup %716  ;;  %v554_v6 = vmul.f32 %v1140_v62, %v483_v13  ;;  %730 = vrsqrt.f32 %v363_v22 }
  0xc1   :  { %v719_v58 = vpop.eup %718  ;;  %619 = vst [vmem:[#allocation5 + $0x48] sm:$0xff] %v555_v30  ;;  %v486_v16 = vmul.f32 %v717_v46, %v937_v20  ;;  %v366_v59 = vadd.f32 1e-06, %v302_v31  ;;  %v365_v0 = vadd.f32 1e-06, %v301_v7 }
  0xc2   :  { %618 = vst [vmem:[#allocation5 + $0x40] sm:$0xff] %v554_v6  ;;  %v485_v17 = vmul.f32 %v719_v58, %v939_v21  ;;  %v197_v8 = vpop.xlane.xlu1 %196  ;;  %v195_v51 = vpop.xlane.xlu0 %194 }
  0xc3   :  { %v557_v1 = vmul.f32 %v1140_v62, %v486_v16  ;;  %732 = vrsqrt.f32 %v366_v59  ;;  %v304_v9 = vmul.f32 0.0078125, %v197_v8  ;;  %v303_v47 = vmul.f32 0.0078125, %v195_v51 }
  0xc4   :  { %v721_v54 = vpop.eup %720  ;;  %v556_v55 = vmul.f32 %v1140_v62, %v485_v17  ;;  %734 = vrsqrt.f32 %v365_v0 }
  0xc5   :  { %v723_v63 = vpop.eup %722  ;;  %621 = vst [vmem:[#allocation5 + $0x58] sm:$0xff] %v557_v1  ;;  %v488_v20 = vmul.f32 %v721_v54, %v945_v24  ;;  %v368_v14 = vadd.f32 1e-06, %v304_v9  ;;  %v367_v39 = vadd.f32 1e-06, %v303_v47 }
  0xc6   :  { %620 = vst [vmem:[#allocation5 + $0x50] sm:$0xff] %v556_v55  ;;  %v487_v21 = vmul.f32 %v723_v63, %v947_v25  ;;  %v201_v23 = vpop.xlane.xlu1 %200  ;;  %v199_v38 = vpop.xlane.xlu0 %198 }
  0xc7   :  { %v559_v12 = vmul.f32 %v1140_v62, %v488_v20  ;;  %736 = vrsqrt.f32 %v368_v14  ;;  %v306_v2 = vmul.f32 0.0078125, %v201_v23  ;;  %v305_v22 = vmul.f32 0.0078125, %v199_v38 }
  0xc8   :  { %v725_v13 = vpop.eup %724  ;;  %v558_v15 = vmul.f32 %v1140_v62, %v487_v21  ;;  %738 = vrsqrt.f32 %v367_v39 }
  0xc9   :  { %v727_v5 = vpop.eup %726  ;;  %623 = vst [vmem:[#allocation5 + $0x68] sm:$0xff] %v559_v12  ;;  %v490_v24 = vmul.f32 %v725_v13, %v953_v28  ;;  %v370_v30 = vadd.f32 1e-06, %v306_v2  ;;  %v369_v31 = vadd.f32 1e-06, %v305_v22 }
  0xca   :  { %622 = vst [vmem:[#allocation5 + $0x60] sm:$0xff] %v558_v15  ;;  %v489_v25 = vmul.f32 %v727_v5, %v955_v29  ;;  %v205_v7 = vpop.xlane.xlu1 %204  ;;  %v203_v46 = vpop.xlane.xlu0 %202 }
  0xcb   :  { %v561_v6 = vmul.f32 %v1140_v62, %v490_v24  ;;  %740 = vrsqrt.f32 %v370_v30  ;;  %v308_v58 = vmul.f32 0.0078125, %v205_v7  ;;  %v307_v16 = vmul.f32 0.0078125, %v203_v46 }
  0xcc   :  { %v729_v59 = vpop.eup %728  ;;  %v560_v0 = vmul.f32 %v1140_v62, %v489_v25  ;;  %742 = vrsqrt.f32 %v369_v31 }
  0xcd   :  { %v731_v17 = vpop.eup %730  ;;  %625 = vst [vmem:[#allocation5 + $0x78] sm:$0xff] %v561_v6  ;;  %v492_v28 = vmul.f32 %v729_v59, %v961_v32  ;;  %v372_v8 = vadd.f32 1e-06, %v308_v58  ;;  %v371_v51 = vadd.f32 1e-06, %v307_v16 }
  0xce   :  { %624 = vst [vmem:[#allocation5 + $0x70] sm:$0xff] %v560_v0  ;;  %v491_v29 = vmul.f32 %v731_v17, %v963_v33  ;;  %v209_v1 = vpop.xlane.xlu1 %208  ;;  %v207_v9 = vpop.xlane.xlu0 %206 }
  0xcf   :  { %v563_v47 = vmul.f32 %v1140_v62, %v492_v28  ;;  %744 = vrsqrt.f32 %v372_v8  ;;  %v310_v54 = vmul.f32 0.0078125, %v209_v1  ;;  %v309_v55 = vmul.f32 0.0078125, %v207_v9 }
  0xd0   :  { %v733_v63 = vpop.eup %732  ;;  %v562_v20 = vmul.f32 %v1140_v62, %v491_v29  ;;  %746 = vrsqrt.f32 %v371_v51 }
  0xd1   :  { %v735_v14 = vpop.eup %734  ;;  %627 = vst [vmem:[#allocation5 + $0x88] sm:$0xff] %v563_v47  ;;  %v494_v32 = vmul.f32 %v733_v63, %v969_v36  ;;  %v374_v39 = vadd.f32 1e-06, %v310_v54  ;;  %v373_v21 = vadd.f32 1e-06, %v309_v55 }
  0xd2   :  { %626 = vst [vmem:[#allocation5 + $0x80] sm:$0xff] %v562_v20  ;;  %v493_v33 = vmul.f32 %v735_v14, %v971_v37  ;;  %v213_v23 = vpop.xlane.xlu1 %212  ;;  %v211_v38 = vpop.xlane.xlu0 %210 }
  0xd3   :  { %v565_v12 = vmul.f32 %v1140_v62, %v494_v32  ;;  %748 = vrsqrt.f32 %v374_v39  ;;  %v312_v2 = vmul.f32 0.0078125, %v213_v23  ;;  %v311_v22 = vmul.f32 0.0078125, %v211_v38 }
  0xd4   :  { %v737_v13 = vpop.eup %736  ;;  %v564_v15 = vmul.f32 %v1140_v62, %v493_v33  ;;  %750 = vrsqrt.f32 %v373_v21 }
  0xd5   :  { %v739_v5 = vpop.eup %738  ;;  %629 = vst [vmem:[#allocation5 + $0x98] sm:$0xff] %v565_v12  ;;  %v496_v36 = vmul.f32 %v737_v13, %v977_v40  ;;  %v376_v24 = vadd.f32 1e-06, %v312_v2  ;;  %v375_v30 = vadd.f32 1e-06, %v311_v22 }
  0xd6   :  { %628 = vst [vmem:[#allocation5 + $0x90] sm:$0xff] %v564_v15  ;;  %v495_v37 = vmul.f32 %v739_v5, %v979_v41  ;;  %v217_v31 = vpop.xlane.xlu1 %216  ;;  %v215_v25 = vpop.xlane.xlu0 %214 }
  0xd7   :  { %v567_v7 = vmul.f32 %v1140_v62, %v496_v36  ;;  %752 = vrsqrt.f32 %v376_v24  ;;  %v314_v46 = vmul.f32 0.0078125, %v217_v31  ;;  %v313_v6 = vmul.f32 0.0078125, %v215_v25 }
  0xd8   :  { %v741_v58 = vpop.eup %740  ;;  %v566_v16 = vmul.f32 %v1140_v62, %v495_v37  ;;  %754 = vrsqrt.f32 %v375_v30 }
  0xd9   :  { %v743_v59 = vpop.eup %742  ;;  %631 = vst [vmem:[#allocation5 + $0xa8] sm:$0xff] %v567_v7  ;;  %v498_v40 = vmul.f32 %v741_v58, %v985_v44  ;;  %v378_v0 = vadd.f32 1e-06, %v314_v46  ;;  %v377_v17 = vadd.f32 1e-06, %v313_v6 }
  0xda   :  { %630 = vst [vmem:[#allocation5 + $0xa0] sm:$0xff] %v566_v16  ;;  %v497_v41 = vmul.f32 %v743_v59, %v987_v45  ;;  %v221_v28 = vpop.xlane.xlu1 %220  ;;  %v219_v8 = vpop.xlane.xlu0 %218 }
  0xdb   :  { %v569_v51 = vmul.f32 %v1140_v62, %v498_v40  ;;  %756 = vrsqrt.f32 %v378_v0  ;;  %v316_v29 = vmul.f32 0.0078125, %v221_v28  ;;  %v315_v1 = vmul.f32 0.0078125, %v219_v8 }
  0xdc   :  { %v745_v9 = vpop.eup %744  ;;  %v568_v47 = vmul.f32 %v1140_v62, %v497_v41  ;;  %758 = vrsqrt.f32 %v377_v17 }
  0xdd   :  { %v747_v54 = vpop.eup %746  ;;  %633 = vst [vmem:[#allocation5 + $0xb8] sm:$0xff] %v569_v51  ;;  %v500_v44 = vmul.f32 %v745_v9, %v993_v48  ;;  %v380_v55 = vadd.f32 1e-06, %v316_v29  ;;  %v379_v63 = vadd.f32 1e-06, %v315_v1 }
  0xde   :  { %632 = vst [vmem:[#allocation5 + $0xb0] sm:$0xff] %v568_v47  ;;  %v499_v45 = vmul.f32 %v747_v54, %v995_v49  ;;  %v225_v20 = vpop.xlane.xlu1 %224  ;;  %v223_v14 = vpop.xlane.xlu0 %222 }
  0xdf   :  { %v571_v32 = vmul.f32 %v1140_v62, %v500_v44  ;;  %760 = vrsqrt.f32 %v380_v55  ;;  %v318_v39 = vmul.f32 0.0078125, %v225_v20  ;;  %v317_v21 = vmul.f32 0.0078125, %v223_v14 }
  0xe0   :  { %v749_v33 = vpop.eup %748  ;;  %v570_v23 = vmul.f32 %v1140_v62, %v499_v45  ;;  %762 = vrsqrt.f32 %v379_v63 }
  0xe1   :  { %v751_v38 = vpop.eup %750  ;;  %635 = vst [vmem:[#allocation5 + $0xc8] sm:$0xff] %v571_v32  ;;  %v502_v48 = vmul.f32 %v749_v33, %v1001_v52  ;;  %v382_v12 = vadd.f32 1e-06, %v318_v39  ;;  %v381_v2 = vadd.f32 1e-06, %v317_v21 }
  0xe2   :  { %634 = vst [vmem:[#allocation5 + $0xc0] sm:$0xff] %v570_v23  ;;  %v501_v49 = vmul.f32 %v751_v38, %v1003_v53  ;;  %v229_v22 = vpop.xlane.xlu1 %228  ;;  %v227_v13 = vpop.xlane.xlu0 %226 }
  0xe3   :  { %v573_v15 = vmul.f32 %v1140_v62, %v502_v48  ;;  %764 = vrsqrt.f32 %v382_v12  ;;  %v320_v5 = vmul.f32 0.0078125, %v229_v22  ;;  %v319_v36 = vmul.f32 0.0078125, %v227_v13 }
  0xe4   :  { %v753_v24 = vpop.eup %752  ;;  %v572_v30 = vmul.f32 %v1140_v62, %v501_v49  ;;  %766 = vrsqrt.f32 %v381_v2 }
  0xe5   :  { %v755_v37 = vpop.eup %754  ;;  %637 = vst [vmem:[#allocation5 + $0xd8] sm:$0xff] %v573_v15  ;;  %v504_v52 = vmul.f32 %v753_v24, %v1009_v56  ;;  %v384_v31 = vadd.f32 1e-06, %v320_v5  ;;  %v383_v25 = vadd.f32 1e-06, %v319_v36 }
  0xe6   :  { %636 = vst [vmem:[#allocation5 + $0xd0] sm:$0xff] %v572_v30  ;;  %v503_v53 = vmul.f32 %v755_v37, %v1011_v57  ;;  %v233_v7 = vpop.xlane.xlu1 %232  ;;  %v231_v46 = vpop.xlane.xlu0 %230 }
  0xe7   :  { %v575_v6 = vmul.f32 %v1140_v62, %v504_v52  ;;  %768 = vrsqrt.f32 %v384_v31  ;;  %v322_v58 = vmul.f32 0.0078125, %v233_v7  ;;  %v321_v16 = vmul.f32 0.0078125, %v231_v46 }
  0xe8   :  { %v757_v59 = vpop.eup %756  ;;  %v574_v40 = vmul.f32 %v1140_v62, %v503_v53  ;;  %770 = vrsqrt.f32 %v383_v25 }
  0xe9   :  { %v759_v0 = vpop.eup %758  ;;  %639 = vst [vmem:[#allocation5 + $0xe8] sm:$0xff] %v575_v6  ;;  %v506_v56 = vmul.f32 %v757_v59, %v1017_v60  ;;  %v386_v17 = vadd.f32 1e-06, %v322_v58  ;;  %v385_v41 = vadd.f32 1e-06, %v321_v16 }
  0xea   :  { %638 = vst [vmem:[#allocation5 + $0xe0] sm:$0xff] %v574_v40  ;;  %v505_v57 = vmul.f32 %v759_v0, %v1019_v61  ;;  %v237_v28 = vpop.xlane.xlu1 %236  ;;  %v235_v8 = vpop.xlane.xlu0 %234 }
  0xeb   :  { %v577_v51 = vmul.f32 %v1140_v62, %v506_v56  ;;  %772 = vrsqrt.f32 %v386_v17  ;;  %v324_v29 = vmul.f32 0.0078125, %v237_v28  ;;  %v323_v1 = vmul.f32 0.0078125, %v235_v8 }
  0xec   :  { %v761_v9 = vpop.eup %760  ;;  %v576_v47 = vmul.f32 %v1140_v62, %v505_v57  ;;  %774 = vrsqrt.f32 %v385_v41 }
  0xed   :  { %v763_v54 = vpop.eup %762  ;;  %641 = vst [vmem:[#allocation5 + $0xf8] sm:$0xff] %v577_v51  ;;  %v508_v60 = vmul.f32 %v761_v9, %v1025_v3  ;;  %v388_v44 = vadd.f32 1e-06, %v324_v29  ;;  %v387_v55 = vadd.f32 1e-06, %v323_v1 }
  0xee   :  { %640 = vst [vmem:[#allocation5 + $0xf0] sm:$0xff] %v576_v47  ;;  %v507_v61 = vmul.f32 %v763_v54, %v1027_v4  ;;  %v241_v63 = vpop.xlane.xlu1 %240  ;;  %v239_v45 = vpop.xlane.xlu0 %238 }
  0xef   :  { %v579_v20 = vmul.f32 %v1140_v62, %v508_v60  ;;  %776 = vrsqrt.f32 %v388_v44  ;;  %v326_v14 = vmul.f32 0.0078125, %v241_v63  ;;  %v325_v32 = vmul.f32 0.0078125, %v239_v45 }
  0xf0   :  { %v765_v39 = vpop.eup %764  ;;  %v578_v21 = vmul.f32 %v1140_v62, %v507_v61  ;;  %778 = vrsqrt.f32 %v387_v55 }
  0xf1   :  { %v767_v33 = vpop.eup %766  ;;  %643 = vst [vmem:[#allocation5 + $0x108] sm:$0xff] %v579_v20  ;;  %v510_v3 = vmul.f32 %v765_v39, %v1033_v10  ;;  %v390_v23 = vadd.f32 1e-06, %v326_v14  ;;  %v389_v38 = vadd.f32 1e-06, %v325_v32 }
  0xf2   :  { %642 = vst [vmem:[#allocation5 + $0x100] sm:$0xff] %v578_v21  ;;  %v509_v4 = vmul.f32 %v767_v33, %v1035_v11  ;;  %v245_v48 = vpop.xlane.xlu1 %244  ;;  %v243_v12 = vpop.xlane.xlu0 %242 }
  0xf3   :  { %v581_v2 = vmul.f32 %v1140_v62, %v510_v3  ;;  %780 = vrsqrt.f32 %v390_v23  ;;  %v328_v49 = vmul.f32 0.0078125, %v245_v48  ;;  %v327_v22 = vmul.f32 0.0078125, %v243_v12 }
  0xf4   :  { %v769_v13 = vpop.eup %768  ;;  %v580_v15 = vmul.f32 %v1140_v62, %v509_v4  ;;  %782 = vrsqrt.f32 %v389_v38  ;;  %v1305_v38 = vld [vmem:[#allocation8_spill] sm:$0xff] }
  0xf5   :  { %v771_v5 = vpop.eup %770  ;;  %645 = vst [vmem:[#allocation5 + $0x118] sm:$0xff] %v581_v2  ;;  %v512_v10 = vmul.f32 %v769_v13, %v1041_v18  ;;  %v392_v36 = vadd.f32 1e-06, %v328_v49  ;;  %v391_v24 = vadd.f32 1e-06, %v327_v22 }
  0xf6   :  { %644 = vst [vmem:[#allocation5 + $0x110] sm:$0xff] %v580_v15  ;;  %v511_v11 = vmul.f32 %v771_v5, %v1043_v19  ;;  %v249_v30 = vpop.xlane.xlu1 %248  ;;  %v247_v37 = vpop.xlane.xlu0 %246  ;;  %v1306_v5 = vld [vmem:[#allocation9_spill] sm:$0xff] }
  0xf7   :  { %v583_v52 = vmul.f32 %v1140_v62, %v512_v10  ;;  %784 = vrsqrt.f32 %v392_v36  ;;  %v330_v31 = vmul.f32 0.0078125, %v249_v30  ;;  %v329_v25 = vmul.f32 0.0078125, %v247_v37 }
  0xf8   :  { %v773_v53 = vpop.eup %772  ;;  %v582_v7 = vmul.f32 %v1140_v62, %v511_v11  ;;  %786 = vrsqrt.f32 %v391_v24  ;;  %v1307_v24 = vld [vmem:[#allocation10_spill] sm:$0xff] }
  0xf9   :  { %v775_v46 = vpop.eup %774  ;;  %647 = vst [vmem:[#allocation5 + $0x128] sm:$0xff] %v583_v52  ;;  %v514_v18 = vmul.f32 %v773_v53, %v1049_v26  ;;  %v394_v6 = vadd.f32 1e-06, %v330_v31  ;;  %v393_v58 = vadd.f32 1e-06, %v329_v25 }
  0xfa   :  { %646 = vst [vmem:[#allocation5 + $0x120] sm:$0xff] %v582_v7  ;;  %v513_v19 = vmul.f32 %v775_v46, %v1051_v27  ;;  %v253_v16 = vpop.xlane.xlu1 %252  ;;  %v251_v59 = vpop.xlane.xlu0 %250 }
  0xfb   :  { %v585_v40 = vmul.f32 %v1140_v62, %v514_v18  ;;  %788 = vrsqrt.f32 %v394_v6  ;;  %v332_v0 = vmul.f32 0.0078125, %v253_v16  ;;  %v331_v56 = vmul.f32 0.0078125, %v251_v59  ;;  %v1308_v18 = vld [vmem:[#allocation11_spill] sm:$0xff]  ;;  %v1309_v16 = vld [vmem:[#allocation12_spill] sm:$0xff] }
  0xfc   :  { %v777_v17 = vpop.eup %776  ;;  %v584_v41 = vmul.f32 %v1140_v62, %v513_v19  ;;  %790 = vrsqrt.f32 %v393_v58 }
  0xfd   :  { %v779_v57 = vpop.eup %778  ;;  %649 = vst [vmem:[#allocation5 + $0x138] sm:$0xff] %v585_v40  ;;  %v516_v26 = vmul.f32 %v777_v17, %v1057_v34  ;;  %v396_v28 = vadd.f32 1e-06, %v332_v0  ;;  %v395_v8 = vadd.f32 1e-06, %v331_v56 }
  0xfe   :  { %648 = vst [vmem:[#allocation5 + $0x130] sm:$0xff] %v584_v41  ;;  %v515_v27 = vmul.f32 %v779_v57, %v1059_v35  ;;  %v257_v51 = vpop.xlane.xlu1 %256  ;;  %v255_v29 = vpop.xlane.xlu0 %254 }
  0xff   :  { %v587_v1 = vmul.f32 %v1140_v62, %v516_v26  ;;  %792 = vrsqrt.f32 %v396_v28  ;;  %v334_v9 = vmul.f32 0.0078125, %v257_v51  ;;  %v333_v47 = vmul.f32 0.0078125, %v255_v29 }
 0x100   :  { %v781_v54 = vpop.eup %780  ;;  %v586_v60 = vmul.f32 %v1140_v62, %v515_v27  ;;  %794 = vrsqrt.f32 %v395_v8  ;;  %v1310_v8 = vld [vmem:[#allocation13_spill] sm:$0xff] }
 0x101   :  { %v783_v44 = vpop.eup %782  ;;  %651 = vst [vmem:[#allocation5 + $0x148] sm:$0xff] %v587_v1  ;;  %v518_v34 = vmul.f32 %v781_v54, %v1065_v42  ;;  %v398_v55 = vadd.f32 1e-06, %v334_v9  ;;  %v397_v61 = vadd.f32 1e-06, %v333_v47  ;;  %v1311_v1 = vld [vmem:[#allocation14_spill] sm:$0xff] }
 0x102   :  { %650 = vst [vmem:[#allocation5 + $0x140] sm:$0xff] %v586_v60  ;;  %v517_v35 = vmul.f32 %v783_v44, %v1067_v43  ;;  %v261_v63 = vpop.xlane.xlu1 %260  ;;  %v259_v45 = vpop.xlane.xlu0 %258 }
 0x103   :  { %v589_v20 = vmul.f32 %v1140_v62, %v518_v34  ;;  %796 = vrsqrt.f32 %v398_v55  ;;  %v336_v14 = vmul.f32 0.0078125, %v261_v63  ;;  %v335_v32 = vmul.f32 0.0078125, %v259_v45  ;;  %v1312_v63 = vld [vmem:[#allocation15_spill] sm:$0xff] }
 0x104   :  { %v785_v39 = vpop.eup %784  ;;  %v588_v21 = vmul.f32 %v1140_v62, %v517_v35  ;;  %798 = vrsqrt.f32 %v397_v61 }
 0x105   :  { %v787_v33 = vpop.eup %786  ;;  %653 = vst [vmem:[#allocation5 + $0x158] sm:$0xff] %v589_v20  ;;  %v520_v42 = vmul.f32 %v785_v39, %v1073_v50  ;;  %v400_v3 = vadd.f32 1e-06, %v336_v14  ;;  %v399_v23 = vadd.f32 1e-06, %v335_v32  ;;  %v1313_v32 = vld [vmem:[#allocation16_spill] sm:$0xff] }
 0x106   :  { %652 = vst [vmem:[#allocation5 + $0x150] sm:$0xff] %v588_v21  ;;  %v519_v43 = vmul.f32 %v787_v33, %v1305_v38  ;;  %v265_v4 = vpop.xlane.xlu1 %264  ;;  %v263_v48 = vpop.xlane.xlu0 %262 }
 0x107   :  { %v591_v12 = vmul.f32 %v1140_v62, %v520_v42  ;;  %800 = vrsqrt.f32 %v400_v3  ;;  %v338_v2 = vmul.f32 0.0078125, %v265_v4  ;;  %v337_v49 = vmul.f32 0.0078125, %v263_v48  ;;  %v1314_v48 = vld [vmem:[#allocation17_spill] sm:$0xff] }
 0x108   :  { %v789_v22 = vpop.eup %788  ;;  %v590_v13 = vmul.f32 %v1140_v62, %v519_v43  ;;  %802 = vrsqrt.f32 %v399_v23 }
 0x109   :  { %v791_v15 = vpop.eup %790  ;;  %655 = vst [vmem:[#allocation5 + $0x168] sm:$0xff] %v591_v12  ;;  %v522_v50 = vmul.f32 %v789_v22, %v1306_v5  ;;  %v402_v10 = vadd.f32 1e-06, %v338_v2  ;;  %v401_v36 = vadd.f32 1e-06, %v337_v49  ;;  %v1315_v22 = vld [vmem:[#allocation18_spill] sm:$0xff] }
 0x10a   :  { %654 = vst [vmem:[#allocation5 + $0x160] sm:$0xff] %v590_v13  ;;  %v521_v11 = vmul.f32 %v791_v15, %v1307_v24  ;;  %v269_v30 = vpop.xlane.xlu1 %268  ;;  %v267_v37 = vpop.xlane.xlu0 %266 }
 0x10b   :  { %v593_v52 = vmul.f32 %v1140_v62, %v522_v50  ;;  %804 = vrsqrt.f32 %v402_v10  ;;  %v340_v31 = vmul.f32 0.0078125, %v269_v30  ;;  %v339_v25 = vmul.f32 0.0078125, %v267_v37 }
 0x10c   :  { %v793_v53 = vpop.eup %792  ;;  %v592_v7 = vmul.f32 %v1140_v62, %v521_v11  ;;  %806 = vrsqrt.f32 %v401_v36  ;;  %v1316_v36 = vld [vmem:[#allocation19_spill] sm:$0xff]  ;;  %v1317_v11 = vld [vmem:[#allocation20_spill] sm:$0xff] }
 0x10d   :  { %v795_v46 = vpop.eup %794  ;;  %657 = vst [vmem:[#allocation5 + $0x178] sm:$0xff] %v593_v52  ;;  %v524_v6 = vmul.f32 %v793_v53, %v1308_v18  ;;  %v404_v58 = vadd.f32 1e-06, %v340_v31  ;;  %v403_v19 = vadd.f32 1e-06, %v339_v25  ;;  %v1318_v53 = vld [vmem:[#allocation21_spill] sm:$0xff] }
 0x10e   :  { %656 = vst [vmem:[#allocation5 + $0x170] sm:$0xff] %v592_v7  ;;  %v523_v59 = vmul.f32 %v795_v46, %v1309_v16  ;;  %v273_v40 = vpop.xlane.xlu1 %272  ;;  %v271_v0 = vpop.xlane.xlu0 %270  ;;  %v1319_v46 = vld [vmem:[#allocation22_spill] sm:$0xff] }
 0x10f   :  { %v595_v56 = vmul.f32 %v1140_v62, %v524_v6  ;;  %808 = vrsqrt.f32 %v404_v58  ;;  %v342_v17 = vmul.f32 0.0078125, %v273_v40  ;;  %v341_v41 = vmul.f32 0.0078125, %v271_v0  ;;  %v825_v0 = vld [vmem:[#allocation2 + $0x1e0] sm:$0xff] }
 0x110   :  { %v797_v57 = vpop.eup %796  ;;  %v594_v26 = vmul.f32 %v1140_v62, %v523_v59  ;;  %810 = vrsqrt.f32 %v403_v19  ;;  %v824_v59 = vld [vmem:[#allocation2 + $0x1e8] sm:$0xff] }
 0x111   :  { %v799_v28 = vpop.eup %798  ;;  %659 = vst [vmem:[#allocation5 + $0x188] sm:$0xff] %v595_v56  ;;  %v526_v27 = vmul.f32 %v797_v57, %v1310_v8  ;;  %v406_v51 = vadd.f32 1e-06, %v342_v17  ;;  %v405_v29 = vadd.f32 1e-06, %v341_v41 }
 0x112   :  { %658 = vst [vmem:[#allocation5 + $0x180] sm:$0xff] %v594_v26  ;;  %v525_v9 = vmul.f32 %v799_v28, %v1311_v1  ;;  %v277_v47 = vpop.xlane.xlu1 %276  ;;  %v275_v54 = vpop.xlane.xlu0 %274  ;;  %v826_v28 = vld [vmem:[#allocation2 + $0x1f8] sm:$0xff] }
 0x113   :  { %v597_v60 = vmul.f32 %v1140_v62, %v526_v27  ;;  %812 = vrsqrt.f32 %v406_v51  ;;  %v344_v44 = vmul.f32 0.0078125, %v277_v47  ;;  %v343_v34 = vmul.f32 0.0078125, %v275_v54  ;;  %v827_v27 = vld [vmem:[#allocation2 + $0x1f0] sm:$0xff] }
 0x114   :  { %v801_v55 = vpop.eup %800  ;;  %v596_v61 = vmul.f32 %v1140_v62, %v525_v9  ;;  %814 = vrsqrt.f32 %v405_v29 }
 0x115   :  { %v803_v35 = vpop.eup %802  ;;  %661 = vst [vmem:[#allocation5 + $0x198] sm:$0xff] %v597_v60  ;;  %v528_v45 = vmul.f32 %v801_v55, %v1312_v63  ;;  %v408_v20 = vadd.f32 1e-06, %v344_v44  ;;  %v407_v14 = vadd.f32 1e-06, %v343_v34 }
 0x116   :  { %660 = vst [vmem:[#allocation5 + $0x190] sm:$0xff] %v596_v61  ;;  %v527_v39 = vmul.f32 %v803_v35, %v1313_v32  ;;  %v281_v21 = vpop.xlane.xlu1 %280  ;;  %v279_v33 = vpop.xlane.xlu0 %278 }
 0x117   :  { %v599_v42 = vmul.f32 %v1140_v62, %v528_v45  ;;  %816 = vrsqrt.f32 %v408_v20  ;;  %v346_v3 = vmul.f32 0.0078125, %v281_v21  ;;  %v345_v23 = vmul.f32 0.0078125, %v279_v33 }
 0x118   :  { %v805_v38 = vpop.eup %804  ;;  %v598_v43 = vmul.f32 %v1140_v62, %v527_v39  ;;  %818 = vrsqrt.f32 %v407_v14 }
 0x119   :  { %v807_v4 = vpop.eup %806  ;;  %663 = vst [vmem:[#allocation5 + $0x1a8] sm:$0xff] %v599_v42  ;;  %v530_v12 = vmul.f32 %v805_v38, %v1314_v48  ;;  %v410_v2 = vadd.f32 1e-06, %v346_v3  ;;  %v409_v49 = vadd.f32 1e-06, %v345_v23 }
 0x11a   :  { %662 = vst [vmem:[#allocation5 + $0x1a0] sm:$0xff] %v598_v43  ;;  %v529_v13 = vmul.f32 %v807_v4, %v1315_v22 }
 0x11b   :  { %v601_v15 = vmul.f32 %v1140_v62, %v530_v12  ;;  %820 = vrsqrt.f32 %v410_v2 }
 0x11c   :  { %v809_v5 = vpop.eup %808  ;;  %v600_v50 = vmul.f32 %v1140_v62, %v529_v13  ;;  %822 = vrsqrt.f32 %v409_v49 }
 0x11d   :  { %v811_v10 = vpop.eup %810  ;;  %665 = vst [vmem:[#allocation5 + $0x1b8] sm:$0xff] %v601_v15  ;;  %v532_v24 = vmul.f32 %v809_v5, %v1316_v36 }
 0x11e   :  { %664 = vst [vmem:[#allocation5 + $0x1b0] sm:$0xff] %v600_v50  ;;  %v531_v30 = vmul.f32 %v811_v10, %v1317_v11 }
 0x11f   :  { %v603_v37 = vmul.f32 %v1140_v62, %v532_v24 }
 0x120   :  { %v813_v52 = vpop.eup %812  ;;  %v602_v31 = vmul.f32 %v1140_v62, %v531_v30 }
 0x121   :  { %v815_v25 = vpop.eup %814  ;;  %667 = vst [vmem:[#allocation5 + $0x1c8] sm:$0xff] %v603_v37  ;;  %v534_v7 = vmul.f32 %v813_v52, %v1318_v53 }
 0x122   :  { %666 = vst [vmem:[#allocation5 + $0x1c0] sm:$0xff] %v602_v31  ;;  %v533_v18 = vmul.f32 %v815_v25, %v1319_v46 }
 0x123   :  { %v605_v6 = vmul.f32 %v1140_v62, %v534_v7 }
 0x124   :  { %v817_v58 = vpop.eup %816  ;;  %v604_v19 = vmul.f32 %v1140_v62, %v533_v18 }
 0x125   :  { %v819_v16 = vpop.eup %818  ;;  %669 = vst [vmem:[#allocation5 + $0x1d8] sm:$0xff] %v605_v6  ;;  %v536_v40 = vmul.f32 %v824_v59, %v817_v58 }
 0x126   :  { %668 = vst [vmem:[#allocation5 + $0x1d0] sm:$0xff] %v604_v19  ;;  %v535_v56 = vmul.f32 %v825_v0, %v819_v16 }
 0x127   :  { %v607_v17 = vmul.f32 %v1140_v62, %v536_v40 }
 0x128   :  { %v821_v41 = vpop.eup %820  ;;  %v606_v57 = vmul.f32 %v1140_v62, %v535_v56 }
 0x129   :  { %v823_v26 = vpop.eup %822  ;;  %671 = vst [vmem:[#allocation5 + $0x1e8] sm:$0xff] %v607_v17  ;;  %v538_v8 = vmul.f32 %v826_v28, %v821_v41 }
 0x12a   :  { %670 = vst [vmem:[#allocation5 + $0x1e0] sm:$0xff] %v606_v57  ;;  %v537_v51 = vmul.f32 %v827_v27, %v823_v26 }
 0x12b   :  { %v609_v29 = vmul.f32 %v1140_v62, %v538_v8 }
 0x12c   :  { %v608_v1 = vmul.f32 %v1140_v62, %v537_v51 }
 0x12d   :  { %673 = vst [vmem:[#allocation5 + $0x1f8] sm:$0xff] %v609_v29 }
 0x12e   :  { %672 = vst [vmem:[#allocation5 + $0x1f0] sm:$0xff] %v608_v1 }
 0x12f   :  { %859 = shalt.err (!%p856_p9)
}
 0x130   :  { %685 = dma.vmem_to_hbm [thread:$0]  %s680_s17, 8192, %s1274_s2, [#allocation4], %s873_s12, %s873_s12, %s874_s13  }
 0x131   :  { %870 = dma.done.wait [#allocation4], 8192  }
 0x132   :  { %871 = vsyncadd [#allocation4], 4294959104 }
 0x133   :  { %689 = vsyncpa [#allocation3], 1 }
 0x134   :  { %690 = vsyncpa [#allocation4], 1 }

</bundles_post_ra>
